<compile_context>
chip_gen: v6e
topology: v6e:2x2x1
jax: 0.10.0
libtpu: 0.0.40
codegen_flags: <defaults>
</compile_context>

<pallas_src>
import math
import functools

import jax
import jax.numpy as jnp
from jax.experimental import pallas as pl
from jax.experimental.pallas import tpu as pltpu


def get_sinusoidal_table(num_embeddings: int, embedding_dim: int, padding_idx):
    """Port of SinusoidalPositionalEmbedding.get_embedding (reference only)."""
    half_dim = embedding_dim // 2
    scale = math.log(10000.0) / (half_dim - 1)
    inv_freq = jnp.exp(jnp.arange(half_dim, dtype=jnp.float32) * -scale)          # (half,)
    args = jnp.arange(num_embeddings, dtype=jnp.float32)[:, None] * inv_freq[None, :]
    emb = jnp.concatenate([jnp.sin(args), jnp.cos(args)], axis=1)                  # (N, 2*half)
    emb = emb.reshape(num_embeddings, -1)
    if embedding_dim % 2 == 1:
        emb = jnp.concatenate([emb, jnp.zeros((num_embeddings, 1), jnp.float32)], axis=1)
    if padding_idx is not None:
        emb = emb.at[padding_idx, :].set(0.0)
    return emb


def _sinpos_kernel(ids_ref, invf_ref, out_ref, *, padding_idx: int, embedding_dim: int):
    # ids_ref: (Bt, S) int32   invf_ref: (1, half) f32   out_ref: (Bt, S, D) f32
    ids = ids_ref[...]                                   # (Bt, S) int32
    Bt, S = ids.shape

    # --- make_positions ---------------------------------------------------
    mask = (ids != padding_idx).astype(jnp.int32)        # (Bt, S) 0/1

    # Inclusive prefix-sum along the sequence (lane) axis: log2(S) static
    # shift-and-add steps (exact integer cumsum, no (S,S) intermediates).
    csum = mask
    shift = 1
    while shift < S:
        shifted = jnp.concatenate(
            [jnp.zeros((Bt, shift), jnp.int32), csum[:, : S - shift]], axis=1)
        csum = csum + shifted
        shift *= 2

    positions = csum * mask + padding_idx                # (Bt, S) int32, exact
    pos_f = positions.astype(jnp.float32)

    # --- sinusoidal embedding directly on the EUP --------------------------
    inv_freq = invf_ref[...]                             # (1, half) f32
    args = pos_f[:, :, None] * inv_freq[None, :, :]      # (Bt, S, half)
    parts = [jnp.sin(args), jnp.cos(args)]               # fairseq layout: [sin | cos]
    if embedding_dim % 2 == 1:
        parts.append(jnp.zeros((Bt, S, 1), jnp.float32))
    emb = jnp.concatenate(parts, axis=-1)                # (Bt, S, D)

    # Pad tokens -> zero rows (mirrors weights[padding_idx, :] = 0).
    emb = emb * mask.astype(jnp.float32)[:, :, None]

    out_ref[...] = emb


def _pick_batch_tile(bsz: int) -> int:
    # Prefer sublane-aligned tiles that divide bsz; otherwise take the whole
    # (small / ragged) batch in a single grid step.
    for bt in (32, 16, 8):
        if bsz % bt == 0:
            return bt
    return bsz


def sinusoidal_positional_embedding(input_ids, embedding_dim: int, padding_idx: int,
                                    init_size: int = 1024):
    """Equivalent of SinusoidalPositionalEmbedding.forward(input) (no incremental state)."""
    del init_size  # table-free: any position is supported, matching the auto-growing table
    bsz, seq_len = input_ids.shape
    half_dim = embedding_dim // 2

    scale = math.log(10000.0) / (half_dim - 1)
    inv_freq = jnp.exp(jnp.arange(half_dim, dtype=jnp.float32) * -scale)
    inv_freq = inv_freq.reshape(1, half_dim)             # (1, half) f32

    ids = input_ids.astype(jnp.int32)
    bt = _pick_batch_tile(bsz)
    kernel = functools.partial(_sinpos_kernel, padding_idx=padding_idx,
                               embedding_dim=embedding_dim)

    # TODO(synk): for very long sequences, additionally tile S with a carried
    # cumsum offset in SMEM scratch ("arbitrary" seq axis).
    out = pl.pallas_call(
        kernel,
        out_shape=jax.ShapeDtypeStruct((bsz, seq_len, embedding_dim), jnp.float32),
        grid_spec=pltpu.PrefetchScalarGridSpec(
            num_scalar_prefetch=0,
            grid=(bsz // bt,),
            in_specs=[
                pl.BlockSpec((bt, seq_len), lambda b: (b, 0)),
                pl.BlockSpec((1, half_dim), lambda b: (0, 0)),
            ],
            out_specs=pl.BlockSpec((bt, seq_len, embedding_dim), lambda b: (b, 0, 0)),
        ),
        compiler_params=pltpu.CompilerParams(dimension_semantics=("parallel",)),
    )(ids, inv_freq)
    return out


if __name__ == "__main__":
    key = jax.random.PRNGKey(0)
    bsz, seq_len = 2, 8
    embedding_dim = 32
    padding_idx = 1
    init_size = 1024

    # deterministic token ids with some trailing padding
    ids = jax.random.randint(key, (bsz, seq_len), 2, 50, dtype=jnp.int32)
    ids = ids.at[0, 6:].set(padding_idx)
    ids = ids.at[1, 3:].set(padding_idx)

    out = sinusoidal_positional_embedding(ids, embedding_dim, padding_idx, init_size)
    out = jax.block_until_ready(out)

    # pure-JAX reference mirroring the PyTorch forward (table + gather)
    table = get_sinusoidal_table(max(init_size, padding_idx + 1 + seq_len),
                                 embedding_dim, padding_idx)
    mask = (ids != padding_idx).astype(jnp.int32)
    pos = jnp.cumsum(mask, axis=1) * mask + padding_idx
    ref = jnp.take(table, pos.reshape(-1), axis=0).reshape(bsz, seq_len, embedding_dim)

    assert out.shape == (bsz, seq_len, embedding_dim)
    assert jnp.allclose(out, ref, atol=1e-4), "mismatch vs reference"

    print("KERNEL_OK")
</pallas_src>

<mosaic_0001>
module attributes {stable_mosaic.version = 11 : i64} {
  func.func @_sinpos_kernel(%arg0: i32, %arg1: memref<2x8xi32, #tpu.memory_space<vmem>>, %arg2: memref<1x16xf32, #tpu.memory_space<vmem>>, %arg3: memref<2x8x32xf32, #tpu.memory_space<vmem>>) attributes {dimension_semantics = [#tpu.dimension_semantics<parallel>], iteration_bounds = array<i64: 1>, scalar_prefetch = 0 : i64, scratch_operands = 0 : i64, tpu.core_type = #tpu.core_type<tc>, window_params = [{transform_indices = @transform_0, window_bounds = array<i64: 2, 8>}, {pipeline_mode = #tpu.pipeline_mode<synchronous>, transform_indices = @transform_1, window_bounds = array<i64: 1, 16>}, {transform_indices = @transform_2, window_bounds = array<i64: 2, 8, 32>}]} {
    %c0 = arith.constant 0 : index
    %c0_0 = arith.constant 0 : index
    %0 = vector.load %arg1[%c0, %c0_0] : memref<2x8xi32, #tpu.memory_space<vmem>>, vector<2x8xi32>
    %c1_i32 = arith.constant 1 : i32
    %1 = vector.broadcast %c1_i32 : i32 to vector<2x8xi32>
    %2 = arith.cmpi ne, %0, %1 : vector<2x8xi32>
    %3 = arith.extui %2 : vector<2x8xi1> to vector<2x8xi32>
    %c0_i32 = arith.constant 0 : i32
    %4 = vector.broadcast %c0_i32 : i32 to vector<2x1xi32>
    %5 = vector.extract_strided_slice %3 {offsets = [0, 0], sizes = [2, 7], strides = [1, 1]} : vector<2x8xi32> to vector<2x7xi32>
    %6 = tpu.concatenate %4, %5 in 1 : vector<2x1xi32>, vector<2x7xi32> -> vector<2x8xi32>
    %7 = arith.addi %3, %6 : vector<2x8xi32>
    %c0_i32_1 = arith.constant 0 : i32
    %8 = vector.broadcast %c0_i32_1 : i32 to vector<2x2xi32>
    %9 = vector.extract_strided_slice %7 {offsets = [0, 0], sizes = [2, 6], strides = [1, 1]} : vector<2x8xi32> to vector<2x6xi32>
    %10 = tpu.concatenate %8, %9 in 1 : vector<2x2xi32>, vector<2x6xi32> -> vector<2x8xi32>
    %11 = arith.addi %7, %10 : vector<2x8xi32>
    %c0_i32_2 = arith.constant 0 : i32
    %12 = vector.broadcast %c0_i32_2 : i32 to vector<2x4xi32>
    %13 = vector.extract_strided_slice %11 {offsets = [0, 0], sizes = [2, 4], strides = [1, 1]} : vector<2x8xi32> to vector<2x4xi32>
    %14 = tpu.concatenate %12, %13 in 1 : vector<2x4xi32>, vector<2x4xi32> -> vector<2x8xi32>
    %15 = arith.addi %11, %14 : vector<2x8xi32>
    %16 = arith.muli %15, %3 : vector<2x8xi32>
    %c1_i32_3 = arith.constant 1 : i32
    %17 = vector.broadcast %c1_i32_3 : i32 to vector<2x8xi32>
    %18 = arith.addi %16, %17 : vector<2x8xi32>
    %19 = arith.sitofp %18 : vector<2x8xi32> to vector<2x8xf32>
    %c0_4 = arith.constant 0 : index
    %c0_5 = arith.constant 0 : index
    %20 = vector.load %arg2[%c0_4, %c0_5] : memref<1x16xf32, #tpu.memory_space<vmem>>, vector<1x16xf32>
    %21 = vector.shape_cast %19 : vector<2x8xf32> to vector<2x8x1xf32>
    %22 = vector.shape_cast %20 : vector<1x16xf32> to vector<1x1x16xf32>
    %23 = vector.broadcast %21 : vector<2x8x1xf32> to vector<2x8x16xf32>
    %24 = vector.broadcast %22 : vector<1x1x16xf32> to vector<2x8x16xf32>
    %25 = arith.mulf %23, %24 : vector<2x8x16xf32>
    %26 = math.sin %25 : vector<2x8x16xf32>
    %27 = math.cos %25 : vector<2x8x16xf32>
    %28 = tpu.concatenate %26, %27 in 2 : vector<2x8x16xf32>, vector<2x8x16xf32> -> vector<2x8x32xf32>
    %29 = arith.sitofp %3 : vector<2x8xi32> to vector<2x8xf32>
    %30 = vector.shape_cast %29 : vector<2x8xf32> to vector<2x8x1xf32>
    %31 = vector.broadcast %30 : vector<2x8x1xf32> to vector<2x8x32xf32>
    %32 = arith.mulf %28, %31 : vector<2x8x32xf32>
    %c0_6 = arith.constant 0 : index
    %c0_7 = arith.constant 0 : index
    %c0_8 = arith.constant 0 : index
    %33 = vector.load %arg3[%c0_6, %c0_7, %c0_8] : memref<2x8x32xf32, #tpu.memory_space<vmem>>, vector<2x8x32xf32>
    tpu.vector_store %arg3[%c0_6, %c0_7, %c0_8], %32 {strides = array<i32>} : memref<2x8x32xf32, #tpu.memory_space<vmem>>, vector<2x8x32xf32>,
    return
  }
  func.func @transform_0(%arg0: i32) -> (i32, i32) {
    %c0_i32 = arith.constant 0 : i32
    %c0_i32_0 = arith.constant 0 : i32
    return %arg0, %c0_i32 : i32, i32
  }
  func.func @transform_1(%arg0: i32) -> (i32, i32) {
    %c0_i32 = arith.constant 0 : i32
    %c0_i32_0 = arith.constant 0 : i32
    %c0_i32_1 = arith.constant 0 : i32
    return %c0_i32, %c0_i32_0 : i32, i32
  }
  func.func @transform_2(%arg0: i32) -> (i32, i32, i32) {
    %c0_i32 = arith.constant 0 : i32
    %c0_i32_0 = arith.constant 0 : i32
    %c0_i32_1 = arith.constant 0 : i32
    return %arg0, %c0_i32, %c0_i32_0 : i32, i32, i32
  }
}

</mosaic_0001>

<bundles_post_ra>
// kernel: tpu_custom_call.1
= control target key start
LH: loop header
LB: loop body
LE: loop exit
PB: predicated region body
PF: predicated region fallthrough
CT: control target
= control target key end

     0   :  { %7 = vsyncpa [#allocation3], 0  ;;  %s745_s0 = inlined_call_operand.hbm [shape: s32[2,8], index: 0, kind: input, shape index: {}]   ;;  %s746_s1 = inlined_call_operand.vmem [shape: f32[1,16], index: 1, kind: input, shape index: {}]   ;;  %s747_s2 = inlined_call_operand.hbm [shape: f32[2,8,32], index: 2, kind: output, shape index: {}]  }
   0x1   :  { %8 = vsyncpa [#allocation4], 0  ;;  %s624_s9 = smov [#allocation2]  }
   0x2   :  { %s15_s10 = sshll.u32 %s624_s9, 4  ;;  %s16_s10 = int_to_ptr.vmem [resolvable:$true] %s15_s10 }
   0x3   :  { %s588_s11 = scalar_lea.vmem %s16_s10, 32  ;;  %p593_p1 = scmp.lt.s32.totalorder %s16_s10, %s16_s10 }
   0x4   :  { %p589_p0 = scmp.ne.s32.totalorder %s16_s10, %s588_s11  ;;  %p594_p2 = scmp.lt.s32.totalorder %s588_s11, %s588_s11 }
   0x6   :  { %p595_p3 = por %p594_p2, %p593_p1 }
   0x8   :  { %p596_p4 = pnand %p595_p3, %p589_p0 }
   0xa   :  { %599 = shalt.err (!%p596_p4)
}
   0xb   :  { %18 = dma.hbm_to_vmem [thread:$0]  %s745_s0, 32, %s16_s10, [#allocation3]  }
   0xc   :  { %620 = dma.done.wait [#allocation3], 32  }
   0xd   :  { %621 = vsyncadd [#allocation3], 4294967264  ;;  %v658_v0 = vld [vmem:[#allocation2] sm:$0x3]  ;;  %v625_v1 = vmov 0   ;;  %s626_s14 = smov 1   ;;  %v46_v9 = vlaneseq }
   0xe   :  { %vm25_vm0 = vcmp.ne.s32.totalorder %v658_v0, 1  ;;  %vm29_vm1 = vcmask 7168   ;;  %s627_s15 = smov 2   ;;  %vm34_vm2 = vcmask 15360   ;;  %s628_s0 = smov 4   ;;  %vm39_vm3 = vcmask 31744  }
   0xf   :  { %v26_v2 = vsel %vm25_vm0, 1, %v625_v1  ;;  %v663_v13 = vshrl.u32 %v46_v9, 7  ;;  %v530_v21 = vld [vmem:[%s746_s1] ss:$0 sm:$0xff]  ;;  %v629_v46 = vmov 683565275  }
  0x10   :  { %27 = vrot.lane.b32.xlu0 %v26_v2, %s626_s14  ;;  %v630_v50 = vmov 2475754826   ;;  %v631_v52 = vmov 2131351028   ;;  %v632_v54 = vmov 2102212464  }
  0x11   :  { %v55_v16 = vsub.s32 1, %v663_v13  ;;  %v48_v17 = vsub.s32 0, %v663_v13  ;;  %v633_v56 = vmov 920167782   ;;  %v634_v63 = vmov 1326507024  }
  0x12   :  { %s636_s1 = smov 16   ;;  %s637_s18 = smov [#allocation5]  }
  0x13   :  { %s518_s19 = sshll.u32 %s637_s18, 4  ;;  %s519_s19 = int_to_ptr.vmem [resolvable:$true] %s518_s19 }
  0x14   :  { %s600_s20 = scalar_lea.vmem %s519_s19, 256  ;;  %p605_p6 = scmp.lt.s32.totalorder %s519_s19, %s519_s19 }
  0x15   :  { %p601_p5 = scmp.ne.s32.totalorder %s519_s19, %s600_s20  ;;  %p606_p7 = scmp.lt.s32.totalorder %s600_s20, %s600_s20 }
  0x17   :  { %p607_p8 = por %p606_p7, %p605_p6 }
  0x19   :  { %p608_p9 = pnand %p607_p8, %p601_p5 }
  0x82   :  { %v28_v3 = vpop.permute.xlu0 %27 }
  0x83   :  { %v30_v4 = vsel %vm29_vm1, 0, %v28_v3 }
  0x84   :  { %v31_v5 = vadd.s32 %v30_v4, %v26_v2 }
  0x86   :  { %32 = vrot.lane.b32.xlu0 %v31_v5, %s627_s15 }
  0xf8   :  { %v33_v6 = vpop.permute.xlu0 %32 }
  0xf9   :  { %v35_v7 = vsel %vm34_vm2, 0, %v33_v6 }
  0xfa   :  { %v36_v8 = vadd.s32 %v35_v7, %v31_v5 }
  0xfc   :  { %37 = vrot.lane.b32.xlu1 %v36_v8, %s628_s0 }
 0x16e   :  { %v38_v10 = vpop.permute.xlu1 %37 }
 0x16f   :  { %v40_v11 = vsel %vm39_vm3, 0, %v38_v10 }
 0x170   :  { %v41_v12 = vadd.s32 %v40_v11, %v36_v8 }
 0x172   :  { %v42_v14 = vmul.u32 %v41_v12, %v26_v2 }
 0x174   :  { %v43_v15 = vadd.s32 1, %v42_v14 }
 0x176   :  { %v44_v18 = vcvt.s32.f32 %v43_v15 }
 0x178   :  { %v56_v19 = vrot.slane %v44_v18, %v55_v16  ;;  %v49_v20 = vrot.slane %v44_v18, %v48_v17 }
 0x17a   :  { %58 = vbcast.lane.b32.xlu0 %v56_v19, 256  ;;  %51 = vbcast.lane.b32.xlu1 %v49_v20, 256 }
 0x1ec   :  { %v59_v22 = vpop.permute.xlu0 %58  ;;  %v52_v23 = vpop.permute.xlu1 %51 }
 0x1ed   :  { %v674_v24 = vmul.f32 %v530_v21, %v59_v22  ;;  %v676_v25 = vmul.f32 %v530_v21, %v52_v23 }
 0x1ef   :  { %v172_v26 = vand.u32 2147483647, %v674_v24  ;;  %v175_v27 = vand.u32 2139095040, %v674_v24  ;;  %v71_v28 = vand.u32 2139095040, %v676_v25  ;;  %v68_v31 = vand.u32 2147483647, %v676_v25 }
 0x1f0   :  { %vm174_vm3 = vcmp.lt.s32.totalorder %v674_v24, 0 }
 0x1f1   :  { %v176_v29 = vshrl.u32 %v175_v27, 23  ;;  %v179_v30 = vand.u32 8388607, %v172_v26  ;;  %v72_v32 = vshrl.u32 %v71_v28, 23  ;;  %v686_v37 = vand.u32 8388607, %v68_v31 }
 0x1f3   :  { %v535_v33 = vadd.s32 4294967169, %v176_v29  ;;  %v531_v34 = vadd.s32 4294967169, %v72_v32  ;;  %v180_v36 = vor.u32 8388608, %v179_v30  ;;  %v76_v44 = vor.u32 8388608, %v686_v37 }
 0x1f5   :  { %v182_v35 = vadd.s32 1, %v535_v33  ;;  %v78_v38 = vadd.s32 1, %v531_v34  ;;  %v688_v43 = vshll.u32 %v180_v36, 8 }
 0x1f7   :  { %vm183_vm4 = vcmp.gt.s32.totalorder %v182_v35, 0  ;;  %vm79_vm5 = vcmp.gt.s32.totalorder %v78_v38, 0 }
 0x1f8   :  { %v184_v39 = vsel %vm183_vm4, %v182_v35, 0  ;;  %v80_v42 = vsel %vm79_vm5, %v78_v38, 0  ;;  %vm173_vm4 = vcmp.le.f32.partialorder %v172_v26, 0.7853982  ;;  %vm70_vm5 = vcmp.lt.s32.totalorder %v676_v25, 0 }
 0x1f9   :  { %v185_v40 = vshrl.u32 %v184_v39, 5  ;;  %v186_v41 = vand.u32 31, %v184_v39  ;;  %v691_v48 = vshrl.u32 %v80_v42, 5  ;;  %v82_v49 = vand.u32 31, %v80_v42 }
 0x1fb   :  { %v187_v45 = vsub.s32 32, %v186_v41  ;;  %v189_v47 = vshll.u32 %v629_v46, %v186_v41  ;;  %v192_v51 = vshll.u32 %v630_v50, %v186_v41  ;;  %v195_v53 = vshll.u32 %v631_v52, %v186_v41 }
 0x1fc   :  { %v198_v55 = vshll.u32 %v632_v54, %v186_v41  ;;  %v201_v57 = vshll.u32 %v633_v56, %v186_v41  ;;  %vm204_vm6 = vcmp.lt.s32.totalorder %v185_v40, 1  ;;  %vm205_vm7 = vcmp.lt.s32.totalorder %v185_v40, 2 }
 0x1fd   :  { %v190_v58 = vshrl.u32 %v630_v50, %v187_v45  ;;  %v193_v59 = vshrl.u32 %v631_v52, %v187_v45  ;;  %v196_v60 = vshrl.u32 %v632_v54, %v187_v45  ;;  %v188_v61 = vshrl.u32 %v629_v46, %v187_v45 }
 0x1fe   :  { %v199_v62 = vshrl.u32 %v633_v56, %v187_v45  ;;  %v202_v1 = vshrl.u32 %v634_v63, %v187_v45  ;;  %v83_v5 = vsub.s32 32, %v82_v49  ;;  %vm206_vm8 = vcmp.lt.s32.totalorder %v185_v40, 3 }
 0x1ff   :  { %v191_v2 = vor.u32 %v190_v58, %v189_v47  ;;  %v194_v3 = vor.u32 %v193_v59, %v192_v51  ;;  %v197_v4 = vor.u32 %v196_v60, %v195_v53  ;;  %vm207_vm9 = vcmp.lt.s32.totalorder %v185_v40, 4 }
 0x200   :  { %v200_v6 = vor.u32 %v199_v62, %v198_v55  ;;  %v203_v7 = vor.u32 %v202_v1, %v201_v57  ;;  %v85_v18 = vshll.u32 %v629_v46, %v82_v49  ;;  %v86_v21 = vshrl.u32 %v630_v50, %v83_v5 }
 0x201   :  { %v208_v8 = vsel %vm204_vm6, %v188_v61, %v191_v2  ;;  %v209_v9 = vsel %vm207_vm9, %v197_v4, 2102212464  ;;  %v212_v10 = vsel %vm204_vm6, %v191_v2, %v194_v3  ;;  %v216_v11 = vsel %vm204_vm6, %v194_v3, %v197_v4 }
 0x202   :  { %v210_v12 = vsel %vm206_vm8, %v194_v3, %v209_v9  ;;  %v213_v14 = vsel %vm207_vm9, %v200_v6, 920167782  ;;  %v217_v15 = vsel %vm207_vm9, %v203_v7, 1326507024  ;;  %v88_v22 = vshll.u32 %v630_v50, %v82_v49 }
 0x203   :  { %v214_v19 = vsel %vm206_vm8, %v197_v4, %v213_v14  ;;  %v218_v20 = vsel %vm206_vm8, %v200_v6, %v217_v15  ;;  %v211_v23 = vsel %vm205_vm7, %v208_v8, %v210_v12  ;;  %v89_v29 = vshrl.u32 %v631_v52, %v83_v5 }
 0x204   :  { %v215_v27 = vsel %vm205_vm7, %v212_v10, %v214_v19  ;;  %v219_v28 = vsel %vm205_vm7, %v216_v11, %v218_v20  ;;  %v87_v35 = vor.u32 %v86_v21, %v85_v18  ;;  %v91_v37 = vshll.u32 %v631_v52, %v82_v49 }
 0x205   :  { %v700_v30 = vmul.u32.u64.low %v688_v43, %v219_v28  ;;  %v701_v32 = vmul.u32.u64.high %v688_v43, %v219_v28, %v700_v30  ;;  %v704_v33 = vmul.u32.u64.low %v688_v43, %v215_v27  ;;  %v705_v34 = vmul.u32.u64.high %v688_v43, %v215_v27, %v704_v33 }
 0x206   :  { %v90_v36 = vor.u32 %v89_v29, %v88_v22  ;;  %v92_v38 = vshrl.u32 %v632_v54, %v83_v5  ;;  %v94_v39 = vshll.u32 %v632_v54, %v82_v49  ;;  %v95_v41 = vshrl.u32 %v633_v56, %v83_v5 }
 0x207   :  { %v98_v42 = vshrl.u32 %v634_v63, %v83_v5  ;;  %v116_v45 = vshll.u32 %v76_v44, 8  ;;  %v227_v40 = vmul.u32 %v688_v43, %v211_v23  ;;  %v84_v47 = vshrl.u32 %v629_v46, %v83_v5 }
 0x208   :  { %v93_v50 = vor.u32 %v92_v38, %v91_v37  ;;  %v97_v51 = vshll.u32 %v633_v56, %v82_v49  ;;  %vm229_vm10 = vc.u32 %v701_v32, %v704_v33  ;;  %v230_v53 = vadd.s32 1, %v705_v34 }
 0x209   :  { %v96_v55 = vor.u32 %v95_v41, %v94_v39  ;;  %vm100_vm11 = vcmp.lt.s32.totalorder %v691_v48, 1  ;;  %vm102_vm12 = vcmp.lt.s32.totalorder %v691_v48, 3  ;;  %vm103_vm13 = vcmp.lt.s32.totalorder %v691_v48, 4 }
 0x20a   :  { %v99_v57 = vor.u32 %v98_v42, %v97_v51  ;;  %v108_v52 = vsel %vm100_vm11, %v87_v35, %v90_v36  ;;  %v231_v44 = vsel %vm229_vm10, %v230_v53, %v705_v34  ;;  %v105_v54 = vsel %vm103_vm13, %v93_v50, 2102212464 }
 0x20b   :  { %v109_v43 = vsel %vm103_vm13, %v96_v55, 920167782  ;;  %v112_v46 = vsel %vm100_vm11, %v90_v36, %v93_v50  ;;  %v232_v58 = vadd.s32 %v231_v44, %v227_v40  ;;  %vm101_vm14 = vcmp.lt.s32.totalorder %v691_v48, 2 }
 0x20c   :  { %v110_v49 = vsel %vm102_vm12, %v93_v50, %v109_v43  ;;  %v113_v56 = vsel %vm103_vm13, %v99_v57, 1326507024  ;;  %v104_v59 = vsel %vm100_vm11, %v84_v47, %v87_v35  ;;  %v106_v60 = vsel %vm102_vm12, %v90_v36, %v105_v54 }
 0x20d   :  { %v111_v61 = vsel %vm101_vm14, %v108_v52, %v110_v49  ;;  %v114_v62 = vsel %vm102_vm12, %v96_v55, %v113_v56  ;;  %v233_v63 = vadd.s32 536870912, %v232_v58  ;;  %v107_v7 = vsel %vm101_vm14, %v104_v59, %v106_v60 }
 0x20e   :  { %v115_v1 = vsel %vm101_vm14, %v112_v46, %v114_v62  ;;  %v715_v2 = vmul.u32.u64.low %v116_v45, %v111_v61  ;;  %v716_v3 = vmul.u32.u64.high %v116_v45, %v111_v61, %v715_v2  ;;  %v123_v48 = vmul.u32 %v116_v45, %v107_v7 }
 0x20f   :  { %v718_v4 = vmul.u32.u64.low %v116_v45, %v115_v1  ;;  %v719_v5 = vmul.u32.u64.high %v116_v45, %v115_v1, %v718_v4  ;;  %v234_v6 = vshrl.u32 %v233_v63, 30  ;;  %v228_v29 = vadd.s32 %v704_v33, %v701_v32 }
 0x210   :  { %v126_v9 = vadd.s32 1, %v716_v3  ;;  %vm69_vm6 = vcmp.le.f32.partialorder %v68_v31, 0.7853982  ;;  %vm264_vm13 = vweird.f32 %v674_v24 }
 0x211   :  { %v235_v8 = vshll.u32 %v234_v6, 30  ;;  %vm125_vm15 = vc.u32 %v719_v5, %v715_v2  ;;  %v124_v53 = vadd.s32 %v715_v2, %v719_v5 }
 0x212   :  { %v127_v11 = vsel %vm125_vm15, %v126_v9, %v716_v3 }
 0x213   :  { %v236_v10 = vsub.s32 %v232_v58, %v235_v8  ;;  %v128_v12 = vadd.s32 %v127_v11, %v123_v48  ;;  %v258_v58 = vsub.s32 4, %v234_v6 }
 0x215   :  { %v238_v14 = vsub.s32 0, %v236_v10  ;;  %v129_v15 = vadd.s32 536870912, %v128_v12  ;;  %v259_v62 = vsel %vm174_vm3, %v258_v58, %v234_v6 }
 0x216   :  { %v261_v1 = vsel %vm173_vm4, 0, %v259_v62 }
 0x217   :  { %v536_v18 = vmin.u32 %v238_v14, %v236_v10  ;;  %v130_v19 = vshrl.u32 %v129_v15, 30  ;;  %v265_v5 = vadd.s32 3, %v261_v1  ;;  %v472_v8 = vand.u32 3, %v261_v1 }
 0x219   :  { %v240_v20 = vclz %v536_v18  ;;  %v131_v21 = vshll.u32 %v130_v19, 30  ;;  %v154_v3 = vsub.s32 4, %v130_v19  ;;  %v266_v9 = vand.u32 3, %v265_v5 }
 0x21a   :  { %vm474_vm7 = vcmp.eq.s32.totalorder %v472_v8, 0  ;;  %vm477_vm8 = vcmp.eq.s32.totalorder %v472_v8, 2  ;;  %vm473_vm11 = vcmp.lt.s32.totalorder %v472_v8, 2 }
 0x21b   :  { %v537_v22 = vadd.s32 4294967294, %v240_v20  ;;  %v132_v23 = vsub.s32 %v128_v12, %v131_v21  ;;  %v155_v7 = vsel %vm70_vm5, %v154_v3, %v130_v19  ;;  %v635_v12 = vmov 0.0  }
 0x21c   :  { %v157_v48 = vsel %vm69_vm6, 0, %v155_v7  ;;  %v547_v14 = vsel %vm25_vm0, 1.0, %v635_v12  ;;  %vm271_vm9 = vcmp.eq.s32.totalorder %v266_v9, 2  ;;  %vm268_vm10 = vcmp.eq.s32.totalorder %v266_v9, 0 }
 0x21d   :  { %vm538_vm1 = vcmp.lt.s32.totalorder %v537_v22, 0  ;;  %v134_v28 = vsub.s32 0, %v132_v23  ;;  %v161_v18 = vadd.s32 3, %v157_v48  ;;  %vm267_vm12 = vcmp.lt.s32.totalorder %v266_v9, 2 }
 0x21e   :  { %v243_v27 = vsel %vm538_vm1, 0, %v537_v22  ;;  %v369_v0 = vand.u32 3, %v157_v48 }
 0x21f   :  { %v244_v30 = vsub.s32 32, %v243_v27  ;;  %v248_v34 = vsub.s32 4294967266, %v243_v27  ;;  %v532_v35 = vmin.u32 %v134_v28, %v132_v23  ;;  %v245_v36 = vshll.u32 %v236_v10, %v243_v27 }
 0x220   :  { %vm374_vm0 = vcmp.eq.s32.totalorder %v369_v0, 2  ;;  %vm371_vm15 = vcmp.eq.s32.totalorder %v369_v0, 0 }
 0x221   :  { %v246_v37 = vshrl.u32 %v228_v29, %v244_v30  ;;  %v249_v38 = vadd.s32 127, %v248_v34  ;;  %v136_v39 = vclz %v532_v35  ;;  %v504_v29 = vrot.slane %v547_v14, %v55_v16 }
 0x222   :  { %v162_v30 = vand.u32 3, %v161_v18 }
 0x223   :  { %v247_v41 = vor.u32 %v246_v37, %v245_v36  ;;  %v250_v42 = vshll.u32 %v249_v38, 23  ;;  %v533_v45 = vadd.s32 4294967294, %v136_v39 }
 0x224   :  { %vm167_vm14 = vcmp.eq.s32.totalorder %v162_v30, 2  ;;  %vm164_vm1 = vcmp.eq.s32.totalorder %v162_v30, 0 }
 0x225   :  { %v251_v40 = vor.u32 4788187, %v250_v42  ;;  %vm534_vm2 = vcmp.lt.s32.totalorder %v533_v45, 0  ;;  %v254_v50 = vcvt.s32.f32 %v247_v41 }
 0x226   :  { %v139_v51 = vsel %vm534_vm2, 0, %v533_v45  ;;  %vm370_vm2 = vcmp.lt.s32.totalorder %v369_v0, 2 }
 0x227   :  { %v252_v47 = vand.u32 2147483647, %v251_v40  ;;  %v140_v55 = vsub.s32 32, %v139_v51  ;;  %v144_v57 = vsub.s32 4294967266, %v139_v51  ;;  %v141_v33 = vshll.u32 %v132_v23, %v139_v51 }
 0x229   :  { %v255_v32 = vmul.f32 %v254_v50, %v252_v47  ;;  %v142_v52 = vshrl.u32 %v124_v53, %v140_v55  ;;  %v145_v44 = vadd.s32 127, %v144_v57  ;;  %v497_v47 = vrot.slane %v547_v14, %v48_v17 }
 0x22b   :  { %v256_v54 = vxor.u32 2147483648, %v255_v32  ;;  %v143_v43 = vor.u32 %v142_v52, %v141_v33  ;;  %v146_v46 = vshll.u32 %v145_v44, 23 }
 0x22d   :  { %v257_v49 = vsel %vm174_vm3, %v256_v54, %v255_v32  ;;  %v147_v56 = vor.u32 4788187, %v146_v46  ;;  %v150_v61 = vcvt.s32.f32 %v143_v43  ;;  %vm163_vm3 = vcmp.lt.s32.totalorder %v162_v30, 2 }
 0x22e   :  { %v260_v59 = vsel %vm173_vm4, %v674_v24, %v257_v49  ;;  %vm160_vm4 = vweird.f32 %v676_v25 }
 0x22f   :  { %572 = vcosq.f32 %v260_v59  ;;  %v148_v60 = vand.u32 2147483647, %v147_v56 }
 0x230   :  { %574 = vsinq.f32 %v260_v59 }
 0x231   :  { %v151_v63 = vmul.f32 %v150_v61, %v148_v60 }
 0x233   :  { %v152_v2 = vxor.u32 2147483648, %v151_v63 }
 0x235   :  { %v153_v4 = vsel %vm70_vm5, %v152_v2, %v151_v63  ;;  %vm490_vm5 = vcmask 130048  }
 0x236   :  { %v156_v26 = vsel %vm69_vm6, %v676_v25, %v153_v4  ;;  %vm510_vm6 = vcmask 261120  }
 0x237   :  { %576 = vcosq.f32 %v156_v26 }
 0x238   :  { %578 = vsinq.f32 %v156_v26 }
 0x23c   :  { %v573_v6 = vpop.eup %572 }
 0x23d   :  { %v575_v10 = vpop.eup %574  ;;  %v272_v11 = vxor.u32 2147483648, %v573_v6 }
 0x23e   :  { %v269_v15 = vxor.u32 2147483648, %v575_v10 }
 0x23f   :  { %v479_v31 = vsel %vm477_vm8, %v272_v11, %v575_v10  ;;  %v273_v20 = vsel %vm271_vm9, %v272_v11, %v575_v10 }
 0x240   :  { %v476_v19 = vsel %vm474_vm7, %v573_v6, %v269_v15  ;;  %v270_v21 = vsel %vm268_vm10, %v573_v6, %v269_v15 }
 0x241   :  { %v480_v22 = vsel %vm473_vm11, %v476_v19, %v479_v31  ;;  %v274_v23 = vsel %vm267_vm12, %v270_v21, %v273_v20 }
 0x242   :  { %v481_v27 = vsel %vm264_vm13, nan, %v480_v22  ;;  %v275_v28 = vsel %vm264_vm13, nan, %v274_v23 }
 0x243   :  { %486 = vrot.lane.b32.xlu0 %v481_v27, %s636_s1 }
 0x244   :  { %v577_v34 = vpop.eup %576 }
 0x245   :  { %v579_v35 = vpop.eup %578  ;;  %v168_v36 = vxor.u32 2147483648, %v577_v34 }
 0x246   :  { %v165_v37 = vxor.u32 2147483648, %v579_v35 }
 0x247   :  { %506 = vbcast.lane.b32.xlu0 %v504_v29, 256  ;;  %v376_v24 = vsel %vm374_vm0, %v168_v36, %v579_v35  ;;  %v169_v38 = vsel %vm167_vm14, %v168_v36, %v579_v35 }
 0x248   :  { %v373_v39 = vsel %vm371_vm15, %v577_v34, %v165_v37  ;;  %v166_v41 = vsel %vm164_vm1, %v577_v34, %v165_v37 }
 0x249   :  { %v377_v42 = vsel %vm370_vm2, %v373_v39, %v376_v24  ;;  %v170_v16 = vsel %vm163_vm3, %v166_v41, %v169_v38 }
 0x24a   :  { %v378_v45 = vsel %vm160_vm4, nan, %v377_v42  ;;  %v171_v40 = vsel %vm160_vm4, nan, %v170_v16 }
 0x24b   :  { %484 = vrot.lane.b32.xlu1 %v378_v45, %s636_s1 }
 0x24f   :  { %499 = vbcast.lane.b32.xlu1 %v497_v47, 256 }
 0x2b5   :  { %v487_v50 = vpop.permute.xlu0 %486 }
 0x2b6   :  { %v492_v53 = vsel %vm490_vm5, %v275_v28, %v487_v50 }
 0x2b9   :  { %v507_v51 = vpop.permute.xlu0 %506 }
 0x2ba   :  { %v509_v55 = vmul.f32 %v507_v51, %v492_v53 }
 0x2bc   :  { %512 = vst.msk [vmem:[#allocation5 + $0x8] sm:$0xff] %vm510_vm6, %v509_v55 }
 0x2bd   :  { %v485_v57 = vpop.permute.xlu1 %484 }
 0x2be   :  { %v491_v32 = vsel %vm490_vm5, %v171_v40, %v485_v57 }
 0x2c1   :  { %v500_v25 = vpop.permute.xlu1 %499 }
 0x2c2   :  { %v508_v33 = vmul.f32 %v500_v25, %v491_v32 }
 0x2c4   :  { %511 = vst.msk [vmem:[#allocation5] sm:$0xff] %vm510_vm6, %v508_v33 }
 0x2c5   :  { %611 = shalt.err (!%p608_p9)
}
 0x2c6   :  { %s638_s21 = smov 128   ;;  %s639_s22 = smov 8  }
 0x2c7   :  { %524 = dma.vmem_to_hbm [thread:$0]  %s519_s19, 256, %s747_s2, [#allocation4], %s638_s21, %s638_s21, %s639_s22  }
 0x2c8   :  { %622 = dma.done.wait [#allocation4], 256  }
 0x2c9   :  { %623 = vsyncadd [#allocation4], 4294967040 }
 0x2ca   :  { %528 = vsyncpa [#allocation3], 1 }
 0x2cb   :  { %529 = vsyncpa [#allocation4], 1 }

</bundles_post_ra>
